<compile_context>
chip_gen: v5e
topology: v5e:2x2
jax: 0.10.0
libtpu: 0.0.40
codegen_flags: <defaults>
</compile_context>

<pallas_src>
import functools

import jax
import jax.numpy as jnp
from jax import lax
from jax.experimental import pallas as pl
from jax.experimental.pallas import tpu as pltpu

EPS = 1e-8
NUM_LINEAR_ITERS = 20
LANES = 128


def _round_up(a, m):
    return ((a + m - 1) // m) * m


def _fold_linears(w, b, n):
    """Fold n applications of x -> x @ W^T + b into one (w_eff, b_eff): O(log n) matmuls."""
    h = w.shape[0]
    hp = lax.Precision.HIGHEST
    base_w = w.T.astype(jnp.float32)                 # (in, out)
    base_b = b.reshape(1, h).astype(jnp.float32)
    res_w = jnp.eye(h, dtype=jnp.float32)
    res_b = jnp.zeros((1, h), dtype=jnp.float32)
    while n > 0:                                     # n is a static Python int
        if n & 1:
            res_b = jnp.dot(res_b, base_w, precision=hp) + base_b
            res_w = jnp.dot(res_w, base_w, precision=hp)
        n >>= 1
        if n:
            base_b = jnp.dot(base_b, base_w, precision=hp) + base_b
            base_w = jnp.dot(base_w, base_w, precision=hp)
    return res_w, res_b


def _packed_kernel(x_ref, wbd_ref, bias_ref, seg_ref, o_ref, *, hidden):
    x = x_ref[...]            # (TMp, 128) f32: LANES//hidden tokens per lane-dense row
    w_bd = wbd_ref[...]       # (128, 128) blockdiag(W_eff)        -- VMEM resident
    b_t = bias_ref[...]       # (1, 128)   tiled effective bias     -- VMEM resident
    seg1 = seg_ref[...]       # (128, 128) blockdiag(ones(hidden))  -- VMEM resident

    # SiLU: x * sigmoid(x).  Exact divide; exp(-x)->inf for very negative x gives sig -> 0.
    x = x * (1.0 / (1.0 + jnp.exp(-x)))

    # Per-token softmax over its own `hidden`-lane segment.  Subtracting the full-row max
    # is a constant shift within every segment, hence exact; exp underflow would need an
    # intra-row spread > ~88, which post-SiLU activations never reach.
    x = x - jnp.max(x, axis=-1, keepdims=True)
    e = jnp.exp(x)
    seg_sum = jnp.dot(e, seg1, preferred_element_type=jnp.float32,
                      precision=lax.Precision.HIGHEST)
    p = e * pl.reciprocal(seg_sum, approx=True)      # denom >= per-segment exp sum > 0

    # 20 chained linears collapsed into one affine map: a single MXU pass per tile.
    y = jnp.dot(p, w_bd, preferred_element_type=jnp.float32,
                precision=lax.Precision.HIGHEST) + b_t

    # RMSNorm per token: y / (sqrt(mean(y^2)) + eps); segment mean via the idle MXU.
    seg_ms = jnp.dot(y * y, seg1, preferred_element_type=jnp.float32,
                     precision=lax.Precision.HIGHEST) * (1.0 / hidden)
    inv = pl.reciprocal(jnp.sqrt(seg_ms) + EPS, approx=False)
    o_ref[...] = (y * inv).astype(o_ref.dtype)


def _fused_jax_path(x, w_eff, b_eff):
    h = x * jax.nn.sigmoid(x)
    h = jax.nn.softmax(h, axis=-1)
    h = jnp.dot(h, w_eff, precision=lax.Precision.HIGHEST) + b_eff[0]
    norm = jnp.sqrt(jnp.mean(h * h, axis=-1, keepdims=True))
    return h / (norm + EPS)


@functools.partial(jax.jit, static_argnames=("min_rows_for_kernel",))
def expand_contract_forward(x, w, b, *, min_rows_for_kernel=2048):
    """x: (B, S, H) f32; w: (H, H) PyTorch nn.Linear weight (out, in); b: (H,)."""
    B, S, H = x.shape
    M = B * S

    # Collapse the 20 repeated linears once per call (log-time; ~12 tiny HLOs).
    w_eff, b_eff = _fold_linears(w, b, NUM_LINEAR_ITERS)

    pack = LANES // H if (LANES % H == 0) else 0
    if pack == 0 or (M % pack) != 0 or M < min_rows_for_kernel:
        # Small / oddly-shaped inputs: XLA's fused elementwise+tiny-matmul path beats a
        # custom-call launch.  (H not dividing 128 also lands here.)
        return _fused_jax_path(x, w_eff, b_eff).astype(x.dtype)

    # ---- Lane-dense repack: `pack` tokens per 128-lane row (free row-major reshape). ----
    Mp = M // pack
    xp = x.reshape(Mp, LANES)

    eye_p = jnp.eye(pack, dtype=jnp.float32)
    w_bd = jnp.kron(eye_p, w_eff)                              # (128, 128) block-diagonal
    seg_ones = jnp.kron(eye_p, jnp.ones((H, H), jnp.float32))  # segment-sum operator
    b_tile = jnp.tile(b_eff, (1, pack))                        # (1, 128)

    # ---- Row tiling: big blocks (~1 MiB), >= 8 grid steps when possible (v7x megacore),
    # no padding: ragged last block handled by Pallas masked writes.
    if Mp <= 8:
        tmp = Mp                                   # single full block (== full array dim)
    else:
        tmp = min(2048, _round_up(pl.cdiv(Mp, 8), 8))
    grid = (pl.cdiv(Mp, tmp),)

    act_kwargs = {}
    if grid[0] >= 4:
        # Deeper buffering hides HBM latency on the streamed blocks; VMEM is plentiful.
        act_kwargs["pipeline_mode"] = pl.Buffered(3)

    flops = 3 * 2 * Mp * LANES * LANES + 10 * Mp * LANES
    transcendentals = 5 * Mp * LANES
    bytes_accessed = 4 * (2 * Mp * LANES + 2 * LANES * LANES + LANES)

    out_p = pl.pallas_call(
        functools.partial(_packed_kernel, hidden=H),
        out_shape=jax.ShapeDtypeStruct((Mp, LANES), x.dtype),
        grid_spec=pltpu.PrefetchScalarGridSpec(
            num_scalar_prefetch=0,
            grid=grid,
            in_specs=[
                pl.BlockSpec((tmp, LANES), lambda i: (i, 0), **act_kwargs),  # streamed
                pl.BlockSpec((LANES, LANES), lambda i: (0, 0)),   # W blockdiag: resident
                pl.BlockSpec((1, LANES), lambda i: (0, 0)),       # bias: resident
                pl.BlockSpec((LANES, LANES), lambda i: (0, 0)),   # segment ones: resident
            ],
            out_specs=pl.BlockSpec((tmp, LANES), lambda i: (i, 0)),
        ),
        compiler_params=pltpu.CompilerParams(
            dimension_semantics=("parallel",)),
        cost_estimate=pl.CostEstimate(
            flops=flops,
            transcendentals=transcendentals,
            bytes_accessed=bytes_accessed),
    )(xp, w_bd, b_tile, seg_ones)

    return out_p.reshape(B, S, H)


def reference_forward(x, w, b):
    """Pure-JAX reference mirroring the PyTorch module (iterative, fp32 matmuls)."""
    h = x * jax.nn.sigmoid(x)
    h = jax.nn.softmax(h, axis=-1)
    for _ in range(NUM_LINEAR_ITERS):
        h = jnp.dot(h, w.T, precision=lax.Precision.HIGHEST) + b
    norm = jnp.sqrt(jnp.mean(h * h, axis=-1, keepdims=True))
    return h / (norm + EPS)


if __name__ == "__main__":
    key = jax.random.PRNGKey(0)
    kx, kw, kb = jax.random.split(key, 3)

    B, S, H = 2, 8, 32  # batch, seq, hidden

    x = jax.random.normal(kx, (B, S, H), dtype=jnp.float32)

    # Deterministic nn.Linear-style init: U(-1/sqrt(H), 1/sqrt(H))
    bound = 1.0 / (H ** 0.5)
    w = jax.random.uniform(kw, (H, H), minval=-bound, maxval=bound, dtype=jnp.float32)
    b = jax.random.uniform(kb, (H,), minval=-bound, maxval=bound, dtype=jnp.float32)

    ref = reference_forward(x, w, b)

    # Force the Pallas path at this small test size (the default threshold would take the
    # fused-XLA fast path for M=16 rows, which is the right production choice).
    out = expand_contract_forward(x, w, b, min_rows_for_kernel=0)
    out = jax.block_until_ready(out)
    assert out.shape == (B, S, H)
    assert jnp.allclose(out, ref, atol=1e-4, rtol=1e-4), (
        float(jnp.max(jnp.abs(out - ref))))

    # Also sanity-check the default (small-M fast) path.
    out_fast = expand_contract_forward(x, w, b)
    out_fast = jax.block_until_ready(out_fast)
    assert jnp.allclose(out_fast, ref, atol=1e-4, rtol=1e-4), (
        float(jnp.max(jnp.abs(out_fast - ref))))

    print("KERNEL_OK")
</pallas_src>

<mosaic_0001>
module attributes {stable_mosaic.version = 11 : i64} {
  func.func @_packed_kernel(%arg0: i32, %arg1: memref<4x128xf32, #tpu.memory_space<vmem>>, %arg2: memref<128x128xf32, #tpu.memory_space<vmem>>, %arg3: memref<1x128xf32, #tpu.memory_space<vmem>>, %arg4: memref<128x128xf32, #tpu.memory_space<vmem>>, %arg5: memref<4x128xf32, #tpu.memory_space<vmem>>) attributes {dimension_semantics = [#tpu.dimension_semantics<parallel>], iteration_bounds = array<i64: 1>, scalar_prefetch = 0 : i64, scratch_operands = 0 : i64, tpu.core_type = #tpu.core_type<tc>, window_params = [{transform_indices = @transform_0, window_bounds = array<i64: 4, 128>}, {pipeline_mode = #tpu.pipeline_mode<synchronous>, transform_indices = @transform_1, window_bounds = array<i64: 128, 128>}, {pipeline_mode = #tpu.pipeline_mode<synchronous>, transform_indices = @transform_2, window_bounds = array<i64: 1, 128>}, {pipeline_mode = #tpu.pipeline_mode<synchronous>, transform_indices = @transform_3, window_bounds = array<i64: 128, 128>}, {transform_indices = @transform_4, window_bounds = array<i64: 4, 128>}]} {
    %c0 = arith.constant 0 : index
    %c0_0 = arith.constant 0 : index
    %0 = vector.load %arg1[%c0, %c0_0] : memref<4x128xf32, #tpu.memory_space<vmem>>, vector<4x128xf32>
    %c0_1 = arith.constant 0 : index
    %c0_2 = arith.constant 0 : index
    %1 = vector.load %arg2[%c0_1, %c0_2] : memref<128x128xf32, #tpu.memory_space<vmem>>, vector<128x128xf32>
    %c0_3 = arith.constant 0 : index
    %c0_4 = arith.constant 0 : index
    %2 = vector.load %arg3[%c0_3, %c0_4] : memref<1x128xf32, #tpu.memory_space<vmem>>, vector<1x128xf32>
    %c0_5 = arith.constant 0 : index
    %c0_6 = arith.constant 0 : index
    %3 = vector.load %arg4[%c0_5, %c0_6] : memref<128x128xf32, #tpu.memory_space<vmem>>, vector<128x128xf32>
    %cst = arith.constant 0.000000e+00 : f32
    %4 = vector.broadcast %cst : f32 to vector<4x128xf32>
    %5 = arith.subf %4, %0 : vector<4x128xf32>
    %6 = math.exp %5 : vector<4x128xf32>
    %cst_7 = arith.constant 1.000000e+00 : f32
    %7 = vector.broadcast %cst_7 : f32 to vector<4x128xf32>
    %8 = arith.addf %7, %6 : vector<4x128xf32>
    %cst_8 = arith.constant 1.000000e+00 : f32
    %9 = vector.broadcast %cst_8 : f32 to vector<4x128xf32>
    %10 = arith.divf %9, %8 : vector<4x128xf32>
    %11 = arith.mulf %0, %10 : vector<4x128xf32>
    %cst_9 = arith.constant dense<0xFF800000> : vector<4xf32>
    %12 = vector.multi_reduction <maximumf>, %11, %cst_9 [1] : vector<4x128xf32> to vector<4xf32>
    %13 = vector.shape_cast %12 : vector<4xf32> to vector<4x1xf32>
    %14 = vector.broadcast %13 : vector<4x1xf32> to vector<4x128xf32>
    %15 = arith.subf %11, %14 : vector<4x128xf32>
    %16 = math.exp %15 : vector<4x128xf32>
    %cst_10 = arith.constant dense<0.000000e+00> : vector<4x128xf32>
    %17 = tpu.matmul %16, %3, %cst_10 {dimension_numbers = #tpu.dot_dimension_numbers<[1], [0], [0], [1], [0, 0, 1, 1], [], []>, precision = #tpu.contract_precision<fp32>} : vector<4x128xf32>, vector<128x128xf32>, vector<4x128xf32> -> vector<4x128xf32>
    %18 = tpu.reciprocal %17 {approx = true} : vector<4x128xf32> -> vector<4x128xf32>
    %19 = arith.mulf %16, %18 : vector<4x128xf32>
    %cst_11 = arith.constant dense<0.000000e+00> : vector<4x128xf32>
    %20 = tpu.matmul %19, %1, %cst_11 {dimension_numbers = #tpu.dot_dimension_numbers<[1], [0], [0], [1], [0, 0, 1, 1], [], []>, precision = #tpu.contract_precision<fp32>} : vector<4x128xf32>, vector<128x128xf32>, vector<4x128xf32> -> vector<4x128xf32>
    %21 = vector.broadcast %2 : vector<1x128xf32> to vector<4x128xf32>
    %22 = arith.addf %20, %21 : vector<4x128xf32>
    %23 = arith.mulf %22, %22 : vector<4x128xf32>
    %cst_12 = arith.constant dense<0.000000e+00> : vector<4x128xf32>
    %24 = tpu.matmul %23, %3, %cst_12 {dimension_numbers = #tpu.dot_dimension_numbers<[1], [0], [0], [1], [0, 0, 1, 1], [], []>, precision = #tpu.contract_precision<fp32>} : vector<4x128xf32>, vector<128x128xf32>, vector<4x128xf32> -> vector<4x128xf32>
    %cst_13 = arith.constant 3.125000e-02 : f32
    %25 = vector.broadcast %cst_13 : f32 to vector<4x128xf32>
    %26 = arith.mulf %24, %25 : vector<4x128xf32>
    %27 = math.sqrt %26 : vector<4x128xf32>
    %cst_14 = arith.constant 9.99999993E-9 : f32
    %28 = vector.broadcast %cst_14 : f32 to vector<4x128xf32>
    %29 = arith.addf %27, %28 : vector<4x128xf32>
    %30 = tpu.reciprocal %29 : vector<4x128xf32> -> vector<4x128xf32>
    %31 = arith.mulf %22, %30 : vector<4x128xf32>
    %c0_15 = arith.constant 0 : index
    %c0_16 = arith.constant 0 : index
    %32 = vector.load %arg5[%c0_15, %c0_16] : memref<4x128xf32, #tpu.memory_space<vmem>>, vector<4x128xf32>
    tpu.vector_store %arg5[%c0_15, %c0_16], %31 {strides = array<i32>} : memref<4x128xf32, #tpu.memory_space<vmem>>, vector<4x128xf32>,
    return
  }
  func.func @transform_0(%arg0: i32) -> (i32, i32) {
    %c0_i32 = arith.constant 0 : i32
    %c0_i32_0 = arith.constant 0 : i32
    return %arg0, %c0_i32 : i32, i32
  }
  func.func @transform_1(%arg0: i32) -> (i32, i32) {
    %c0_i32 = arith.constant 0 : i32
    %c0_i32_0 = arith.constant 0 : i32
    %c0_i32_1 = arith.constant 0 : i32
    return %c0_i32, %c0_i32_0 : i32, i32
  }
  func.func @transform_2(%arg0: i32) -> (i32, i32) {
    %c0_i32 = arith.constant 0 : i32
    %c0_i32_0 = arith.constant 0 : i32
    %c0_i32_1 = arith.constant 0 : i32
    return %c0_i32, %c0_i32_0 : i32, i32
  }
  func.func @transform_3(%arg0: i32) -> (i32, i32) {
    %c0_i32 = arith.constant 0 : i32
    %c0_i32_0 = arith.constant 0 : i32
    %c0_i32_1 = arith.constant 0 : i32
    return %c0_i32, %c0_i32_0 : i32, i32
  }
  func.func @transform_4(%arg0: i32) -> (i32, i32) {
    %c0_i32 = arith.constant 0 : i32
    %c0_i32_0 = arith.constant 0 : i32
    return %arg0, %c0_i32 : i32, i32
  }
}

</mosaic_0001>

<bundles_post_ra>
// kernel: mul.21
= control target key start
LH: loop header
LB: loop body
LE: loop exit
PB: predicated region body
PF: predicated region fallthrough
CT: control target
= control target key end

     0   :  { %s364_s0 = inlined_call_operand.vmem [shape: f32[128,128], index: 0, kind: input, shape index: {}]   ;;  %s365_s1 = inlined_call_operand.vmem [shape: f32[128,128], index: 1, kind: input, shape index: {}]   ;;  %s366_s2 = inlined_call_operand.vmem [shape: f32[128,128], index: 2, kind: output, shape index: {}]  }
   0x1   :  { %v3_v0 = vld [vmem:[%s364_s0] sm:$0xff]  ;;  %v160_v2 = vld [vmem:[%s364_s0 + $0x8] sm:$0xff]  ;;  %v163_v5 = vld [vmem:[%s364_s0 + $0x10] sm:$0xff] }
   0x2   :  { %v4_v1 = vld [vmem:[%s365_s1] sm:$0xff]  ;;  %v161_v4 = vld [vmem:[%s365_s1 + $0x8] sm:$0xff]  ;;  %v164_v6 = vld [vmem:[%s365_s1 + $0x10] sm:$0xff] }
   0x3   :  { %v7_v3 = vmul.f32 %v4_v1, %v3_v0  ;;  %v16_v7 = vmul.f32 %v161_v4, %v160_v2  ;;  %v26_v8 = vmul.f32 %v164_v6, %v163_v5  ;;  %v166_v9 = vld [vmem:[%s364_s0 + $0x18] sm:$0xff]  ;;  %v169_v11 = vld [vmem:[%s364_s0 + $0x20] sm:$0xff]  ;;  %v172_v14 = vld [vmem:[%s364_s0 + $0x28] sm:$0xff] }
   0x4   :  { %v167_v10 = vld [vmem:[%s365_s1 + $0x18] sm:$0xff]  ;;  %v170_v13 = vld [vmem:[%s365_s1 + $0x20] sm:$0xff]  ;;  %v173_v15 = vld [vmem:[%s365_s1 + $0x28] sm:$0xff] }
   0x5   :  { %9 = vst [vmem:[%s366_s2] sm:$0xff] %v7_v3  ;;  %v36_v12 = vmul.f32 %v167_v10, %v166_v9  ;;  %v46_v16 = vmul.f32 %v170_v13, %v169_v11  ;;  %v56_v17 = vmul.f32 %v173_v15, %v172_v14  ;;  %v175_v18 = vld [vmem:[%s364_s0 + $0x30] sm:$0xff]  ;;  %v178_v20 = vld [vmem:[%s364_s0 + $0x38] sm:$0xff]  ;;  %v181_v23 = vld [vmem:[%s364_s0 + $0x40] sm:$0xff] }
   0x6   :  { %162 = vst [vmem:[%s366_s2 + $0x8] sm:$0xff] %v16_v7  ;;  %v176_v19 = vld [vmem:[%s365_s1 + $0x30] sm:$0xff]  ;;  %v179_v22 = vld [vmem:[%s365_s1 + $0x38] sm:$0xff]  ;;  %v182_v24 = vld [vmem:[%s365_s1 + $0x40] sm:$0xff] }
   0x7   :  { %165 = vst [vmem:[%s366_s2 + $0x10] sm:$0xff] %v26_v8  ;;  %v66_v21 = vmul.f32 %v176_v19, %v175_v18  ;;  %v76_v25 = vmul.f32 %v179_v22, %v178_v20  ;;  %v86_v26 = vmul.f32 %v182_v24, %v181_v23  ;;  %v184_v27 = vld [vmem:[%s364_s0 + $0x48] sm:$0xff]  ;;  %v187_v29 = vld [vmem:[%s364_s0 + $0x50] sm:$0xff]  ;;  %v190_v32 = vld [vmem:[%s364_s0 + $0x58] sm:$0xff] }
   0x8   :  { %168 = vst [vmem:[%s366_s2 + $0x18] sm:$0xff] %v36_v12  ;;  %v185_v28 = vld [vmem:[%s365_s1 + $0x48] sm:$0xff]  ;;  %v188_v31 = vld [vmem:[%s365_s1 + $0x50] sm:$0xff]  ;;  %v191_v33 = vld [vmem:[%s365_s1 + $0x58] sm:$0xff] }
   0x9   :  { %171 = vst [vmem:[%s366_s2 + $0x20] sm:$0xff] %v46_v16  ;;  %v96_v30 = vmul.f32 %v185_v28, %v184_v27  ;;  %v106_v34 = vmul.f32 %v188_v31, %v187_v29  ;;  %v116_v35 = vmul.f32 %v191_v33, %v190_v32  ;;  %v193_v36 = vld [vmem:[%s364_s0 + $0x60] sm:$0xff]  ;;  %v196_v38 = vld [vmem:[%s364_s0 + $0x68] sm:$0xff]  ;;  %v199_v41 = vld [vmem:[%s364_s0 + $0x70] sm:$0xff] }
   0xa   :  { %174 = vst [vmem:[%s366_s2 + $0x28] sm:$0xff] %v56_v17  ;;  %v194_v37 = vld [vmem:[%s365_s1 + $0x60] sm:$0xff]  ;;  %v197_v40 = vld [vmem:[%s365_s1 + $0x68] sm:$0xff]  ;;  %v200_v42 = vld [vmem:[%s365_s1 + $0x70] sm:$0xff] }
   0xb   :  { %177 = vst [vmem:[%s366_s2 + $0x30] sm:$0xff] %v66_v21  ;;  %v126_v39 = vmul.f32 %v194_v37, %v193_v36  ;;  %v136_v43 = vmul.f32 %v197_v40, %v196_v38  ;;  %v146_v44 = vmul.f32 %v200_v42, %v199_v41  ;;  %v202_v45 = vld [vmem:[%s364_s0 + $0x78] sm:$0xff] }
   0xc   :  { %180 = vst [vmem:[%s366_s2 + $0x38] sm:$0xff] %v76_v25  ;;  %v203_v46 = vld [vmem:[%s365_s1 + $0x78] sm:$0xff] }
   0xd   :  { %183 = vst [vmem:[%s366_s2 + $0x40] sm:$0xff] %v86_v26  ;;  %v156_v47 = vmul.f32 %v203_v46, %v202_v45 }
   0xe   :  { %186 = vst [vmem:[%s366_s2 + $0x48] sm:$0xff] %v96_v30 }
   0xf   :  { %189 = vst [vmem:[%s366_s2 + $0x50] sm:$0xff] %v106_v34 }
  0x10   :  { %192 = vst [vmem:[%s366_s2 + $0x58] sm:$0xff] %v116_v35 }
  0x11   :  { %195 = vst [vmem:[%s366_s2 + $0x60] sm:$0xff] %v126_v39 }
  0x12   :  { %198 = vst [vmem:[%s366_s2 + $0x68] sm:$0xff] %v136_v43 }
  0x13   :  { %201 = vst [vmem:[%s366_s2 + $0x70] sm:$0xff] %v146_v44 }
  0x14   :  { %204 = vst [vmem:[%s366_s2 + $0x78] sm:$0xff] %v156_v47 }

// kernel: expand_contract_forward.1
= control target key start
LH: loop header
LB: loop body
LE: loop exit
PB: predicated region body
PF: predicated region fallthrough
CT: control target
= control target key end

     0   :  { %vm71_vm4 = vcmask 1043456   ;;  %s1938_s0 = inlined_call_operand.vmem [shape: f32[4,128], index: 0, kind: input, shape index: {}]   ;;  %s1939_s3 = inlined_call_operand.vmem [shape: f32[128,128], index: 3, kind: input, shape index: {}]   ;;  %s1940_s1 = inlined_call_operand.vmem [shape: f32[128,128], index: 1, kind: input, shape index: {}]   ;;  %s1941_s2 = inlined_call_operand.vmem [shape: f32[1,128], index: 2, kind: input, shape index: {}]   ;;  %s1942_s4 = inlined_call_operand.vmem [shape: f32[4,128], index: 4, kind: output, shape index: {}]  }
   0x1   :  { %v1182_v0 = vld [vmem:[%s1938_s0] sm:$0xf]  ;;  %v50_v2 = vld [vmem:[%s1939_s3 + $0x78] sm:$0xff]  ;;  %v49_v3 = vld [vmem:[%s1939_s3 + $0x70] sm:$0xff] }
   0x2   :  { %v51_v1 = vsub.f32 0.0, %v1182_v0  ;;  %v48_v4 = vld [vmem:[%s1939_s3 + $0x68] sm:$0xff]  ;;  %v1194_v6 = vand.u32 4294901760, %v50_v2  ;;  %v1196_v7 = vand.u32 4294901760, %v49_v3  ;;  %v47_v9 = vld [vmem:[%s1939_s3 + $0x60] sm:$0xff]  ;;  %v46_v11 = vld [vmem:[%s1939_s3 + $0x58] sm:$0xff] }
   0x3   :  { %v1198_v8 = vand.u32 4294901760, %v48_v4  ;;  %v1203_v10 = vand.u32 4294901760, %v47_v9  ;;  %v45_v12 = vld [vmem:[%s1939_s3 + $0x50] sm:$0xff]  ;;  %v44_v13 = vld [vmem:[%s1939_s3 + $0x48] sm:$0xff]  ;;  %v43_v17 = vld [vmem:[%s1939_s3 + $0x40] sm:$0xff]  ;;  %v1231_v19 = vand.u32 4294901760, %v46_v11 }
   0x4   :  { %v52_v5 = vmul.f32 1.442695, %v51_v1  ;;  %v1215_v14 = vsub.f32 %v50_v2, %v1194_v6  ;;  %v1218_v15 = vsub.f32 %v49_v3, %v1196_v7  ;;  %79 = vmatpush.msra.mxu0 %v1194_v6  ;;  %275 = vmatpush.msra.mxu3 %v1194_v6  ;;  %v1233_v20 = vand.u32 4294901760, %v45_v12  ;;  %v42_v35 = vld [vmem:[%s1939_s3 + $0x38] sm:$0xff]  ;;  %v41_v36 = vld [vmem:[%s1939_s3 + $0x30] sm:$0xff]  ;;  %v40_v49 = vld [vmem:[%s1939_s3 + $0x28] sm:$0xff] }
   0x5   :  { %v1221_v16 = vsub.f32 %v48_v4, %v1198_v8  ;;  %v1229_v18 = vsub.f32 %v47_v9, %v1203_v10  ;;  %v1235_v21 = vand.u32 4294901760, %v44_v13  ;;  %v1247_v25 = vand.u32 4294901760, %v43_v17  ;;  %v39_v50 = vld [vmem:[%s1939_s3 + $0x20] sm:$0xff]  ;;  %v38_v51 = vld [vmem:[%s1939_s3 + $0x18] sm:$0xff]  ;;  %v37_v57 = vld [vmem:[%s1939_s3 + $0x10] sm:$0xff] }
   0x6   :  { %1142 = vpow2.f32 %v52_v5  ;;  %1998 = vst [vmem:[#allocation2_spill] sm:$0xff] %v1215_v14  ;;  %v1238_v22 = vand.u32 4294901760, %v1215_v14  ;;  %v1241_v23 = vand.u32 4294901760, %v1218_v15  ;;  %81 = vmatpush.msra.mxu0 %v1196_v7  ;;  %222 = vmatpush.msra.mxu2 %v1215_v14  ;;  %v1254_v27 = vsub.f32 %v46_v11, %v1231_v19  ;;  %v36_v62 = vld [vmem:[%s1939_s3 + $0x8] sm:$0xff]  ;;  %v35_v11 = vld [vmem:[%s1939_s3] sm:$0xff] }
   0x7   :  { %1999 = vst [vmem:[#allocation3_spill] sm:$0xff] %v1218_v15  ;;  %v1244_v24 = vand.u32 4294901760, %v1221_v16  ;;  %v1251_v26 = vand.u32 4294901760, %v1229_v18  ;;  %v1257_v28 = vsub.f32 %v45_v12, %v1233_v20  ;;  %v1260_v29 = vsub.f32 %v44_v13, %v1235_v21  ;;  %277 = vmatpush.msra.mxu3 %v1196_v7 }
   0x8   :  { %2000 = vst [vmem:[#allocation4_spill] sm:$0xff] %v1221_v16  ;;  %v122_v30 = vsub.f32 %v1215_v14, %v1238_v22  ;;  %v128_v31 = vsub.f32 %v1218_v15, %v1241_v23  ;;  %83 = vmatpush.msra.mxu0 %v1198_v8  ;;  %v1271_v33 = vand.u32 4294901760, %v1254_v27  ;;  %v1274_v34 = vsub.f32 %v43_v17, %v1247_v25 }
   0x9   :  { %2001 = vst [vmem:[#allocation5_spill] sm:$0xff] %v1229_v18  ;;  %v134_v32 = vsub.f32 %v1221_v16, %v1244_v24  ;;  %225 = vmatpush.msra.mxu2 %v1218_v15  ;;  %279 = vmatpush.msra.mxu3 %v1198_v8  ;;  %v140_v40 = vsub.f32 %v1229_v18, %v1251_v26  ;;  %v1291_v41 = vand.u32 4294901760, %v1257_v28  ;;  %v1297_v43 = vand.u32 4294901760, %v1260_v29 }
   0xa   :  { %2002 = vst [vmem:[#allocation6_spill] sm:$0xff] %v1238_v22  ;;  %v1284_v38 = vand.u32 4294901760, %v122_v30  ;;  %v1286_v39 = vand.u32 4294901760, %v128_v31  ;;  %85 = vmatpush.msra.mxu0 %v1203_v10  ;;  %v146_v45 = vsub.f32 %v1254_v27, %v1271_v33  ;;  %v1307_v46 = vand.u32 4294901760, %v42_v35 }
   0xb   :  { %2003 = vst [vmem:[#allocation7_spill] sm:$0xff] %v1241_v23  ;;  %228 = vmatpush.msra.mxu2 %v1221_v16  ;;  %281 = vmatpush.msra.mxu3 %v1203_v10  ;;  %v1302_v44 = vand.u32 4294901760, %v134_v32  ;;  %v1309_v47 = vand.u32 4294901760, %v41_v36  ;;  %v1313_v48 = vand.u32 4294901760, %v1274_v34  ;;  %v1327_v52 = vand.u32 4294901760, %v140_v40 }
   0xc   :  { %2004 = vst [vmem:[#allocation8_spill] sm:$0xff] %v1244_v24  ;;  %v1143_v37 = vpop.eup %1142  ;;  %124 = vmatpush.msra.mxu1 %v1284_v38  ;;  %87 = vmatpush.msra.mxu0 %v1231_v19  ;;  %v152_v53 = vsub.f32 %v1257_v28, %v1291_v41  ;;  %v158_v54 = vsub.f32 %v1260_v29, %v1297_v43  ;;  %v1346_v58 = vand.u32 4294901760, %v146_v45  ;;  %v1349_v59 = vand.u32 4294901760, %v40_v49 }
   0xd   :  { %2005 = vst [vmem:[#allocation9_spill] sm:$0xff] %v1251_v26  ;;  %v1294_v42 = vadd.f32 1.0, %v1143_v37  ;;  %231 = vmatpush.msra.mxu2 %v1229_v18  ;;  %283 = vmatpush.msra.mxu3 %v1231_v19  ;;  %v1335_v55 = vsub.f32 %v42_v35, %v1307_v46  ;;  %v1338_v56 = vsub.f32 %v41_v36, %v1309_v47  ;;  %v1351_v60 = vand.u32 4294901760, %v39_v50 }
   0xe   :  { %2006 = vst [vmem:[#allocation10_spill] sm:$0xff] %v1254_v27  ;;  %130 = vmatpush.msra.mxu1 %v1286_v39  ;;  %89 = vmatpush.msra.mxu0 %v1233_v20  ;;  %v1353_v61 = vand.u32 4294901760, %v38_v51  ;;  %v164_v63 = vsub.f32 %v1274_v34, %v1313_v48  ;;  %v1369_v3 = vand.u32 4294901760, %v152_v53  ;;  %v1372_v4 = vsub.f32 %v40_v49, %v1349_v59 }
   0xf   :  { %2007 = vst [vmem:[#allocation11_spill] sm:$0xff] %v1257_v28  ;;  %1144 = vrcp.f32 %v1294_v42  ;;  %234 = vmatpush.msra.mxu2 %v1254_v27  ;;  %285 = vmatpush.msra.mxu3 %v1233_v20  ;;  %v1361_v1 = vand.u32 4294901760, %v1335_v55  ;;  %v1364_v2 = vand.u32 4294901760, %v1338_v56  ;;  %v1376_v5 = vsub.f32 %v39_v50, %v1351_v60 }
  0x10   :  { %2008 = vst [vmem:[#allocation12_spill] sm:$0xff] %v1260_v29  ;;  %136 = vmatpush.msra.mxu1 %v1302_v44  ;;  %91 = vmatpush.msra.mxu0 %v1235_v21  ;;  %v1378_v9 = vand.u32 4294901760, %v37_v57  ;;  %vm60_vm0 = vweird.f32 %v1294_v42  ;;  %v64_v13 = vand.u32 2147483647, %v1294_v42  ;;  %v1385_v17 = vand.u32 4294901760, %v158_v54 }
  0x11   :  { %2009 = vst [vmem:[#allocation13_spill] sm:$0xff] %v1271_v33  ;;  %237 = vmatpush.msra.mxu2 %v1257_v28  ;;  %287 = vmatpush.msra.mxu3 %v1235_v21  ;;  %v1387_v30 = vand.u32 4294901760, %v36_v62  ;;  %v170_v32 = vsub.f32 %v1335_v55, %v1361_v1  ;;  %v1395_v35 = vand.u32 4294901760, %v1372_v4  ;;  %v1399_v36 = vsub.f32 %v38_v51, %v1353_v61 }
  0x12   :  { %2010 = vst [vmem:[#allocation14_spill] sm:$0xff] %v1274_v34  ;;  %142 = vmatpush.msra.mxu1 %v1327_v52  ;;  %93 = vmatpush.msra.mxu0 %v1247_v25  ;;  %v66_v37 = vand.u32 2147483648, %v1294_v42  ;;  %v1402_v40 = vand.u32 4294901760, %v164_v63  ;;  %v176_v45 = vsub.f32 %v1338_v56, %v1364_v2  ;;  %v1406_v49 = vand.u32 4294901760, %v35_v11 }
  0x13   :  { %2011 = vst [vmem:[#allocation15_spill] sm:$0xff] %v1291_v41  ;;  %240 = vmatpush.msra.mxu2 %v1260_v29  ;;  %289 = vmatpush.msra.mxu3 %v1247_v25  ;;  %v1412_v51 = vand.u32 4294901760, %v1376_v5  ;;  %v1416_v53 = vsub.f32 %v37_v57, %v1378_v9  ;;  %v1419_v54 = vsub.f32 %v36_v62, %v1387_v30  ;;  %v1429_v29 = vand.u32 4294901760, %v1399_v36 }
  0x14   :  { %2012 = vst [vmem:[#allocation16_spill] sm:$0xff] %v1297_v43  ;;  %148 = vmatpush.msra.mxu1 %v1346_v58  ;;  %95 = vmatpush.msra.mxu0 %v1307_v46  ;;  %vm1438_vm3 = vcmp.eq.f32.partialorder %v64_v13, 8.507059e+37  ;;  %v1454_v13 = vsub.f32 %v35_v11, %v1406_v49 }
  0x15   :  { %2013 = vst [vmem:[#allocation17_spill] sm:$0xff] %v1313_v48  ;;  %v1145_v12 = vpop.eup %1144  ;;  %243 = vmatpush.msra.mxu2 %v1274_v34  ;;  %291 = vmatpush.msra.mxu3 %v1307_v46  ;;  %v182_v34 = vsub.f32 %v1372_v4, %v1395_v35  ;;  %v1450_v28 = vand.u32 4294901760, %v1416_v53 }
  0x16   :  { %2014 = vst [vmem:[#allocation18_spill] sm:$0xff] %v1335_v55  ;;  %v56_v31 = vmul.f32 %v1145_v12, %v1294_v42  ;;  %vm61_vm1 = vweird.f32 %v1145_v12  ;;  %154 = vmatpush.msra.mxu1 %v1369_v3  ;;  %97 = vmatpush.msra.mxu0 %v1309_v47  ;;  %v188_v42 = vsub.f32 %v1376_v5, %v1412_v51  ;;  %v1482_v57 = vand.u32 4294901760, %v1454_v13 }
  0x17   :  { %2015 = vst [vmem:[#allocation19_spill] sm:$0xff] %v1338_v56  ;;  %246 = vmatpush.msra.mxu2 %v1335_v55  ;;  %vm1434_vm2 = vmor %vm60_vm0, %vm61_vm1  ;;  %293 = vmatpush.msra.mxu3 %v1309_v47 }
  0x18   :  { %2016 = vst [vmem:[#allocation20_spill] sm:$0xff] %v1353_v61  ;;  %v57_v50 = vsub.f32 1.0, %v56_v31  ;;  %160 = vmatpush.msra.mxu1 %v1385_v17  ;;  %v1424_v31 = vand.u32 4294901760, %v170_v32  ;;  %99 = vmatpush.msra.mxu0 %v1349_v59  ;;  %v67_v32 = vor.u32 1.1754944e-38, %v66_v37 }
  0x19   :  { %2017 = vst [vmem:[#allocation21_spill] sm:$0xff] %v1361_v1  ;;  %249 = vmatpush.msra.mxu2 %v1338_v56  ;;  %295 = vmatpush.msra.mxu3 %v1349_v59  ;;  %v1466_v56 = vand.u32 4294901760, %v1419_v54 }
  0x1a   :  { %2018 = vst [vmem:[#allocation22_spill] sm:$0xff] %v1364_v2  ;;  %v58_v63 = vmul.f32 %v1145_v12, %v57_v50  ;;  %v1442_v50 = vand.u32 4294901760, %v176_v45  ;;  %166 = vmatpush.msra.mxu1 %v1402_v40  ;;  %101 = vmatpush.msra.mxu0 %v1351_v60  ;;  %v1461_v45 = vand.u32 4294901760, %v182_v34  ;;  %v1477_v34 = vand.u32 4294901760, %v188_v42 }
  0x1b   :  { %2019 = vst [vmem:[#allocation23_spill] sm:$0xff] %v1372_v4  ;;  %252 = vmatpush.msra.mxu2 %v1372_v4  ;;  %297 = vmatpush.msra.mxu3 %v1351_v60 }
  0x1c   :  { %2020 = vst [vmem:[#allocation24_spill] sm:$0xff] %v1376_v5  ;;  %v59_v55 = vadd.f32 %v1145_v12, %v58_v63  ;;  %172 = vmatpush.msra.mxu1 %v1424_v31  ;;  %v194_v63 = vsub.f32 %v1399_v36, %v1429_v29  ;;  %103 = vmatpush.msra.mxu0 %v1353_v61 }
  0x1d   :  { %2021 = vst [vmem:[#allocation25_spill] sm:$0xff] %v1378_v9  ;;  %255 = vmatpush.msra.mxu2 %v1376_v5  ;;  %299 = vmatpush.msra.mxu3 %v1353_v61 }
  0x1e   :  { %2022 = vst [vmem:[#allocation26_spill] sm:$0xff] %v1387_v30  ;;  %v63_v37 = vsel %vm1434_vm2, %v1145_v12, %v59_v55  ;;  %178 = vmatpush.msra.mxu1 %v1442_v50  ;;  %v200_v12 = vsub.f32 %v1416_v53, %v1450_v28  ;;  %105 = vmatpush.msra.mxu0 %v1378_v9 }
  0x1f   :  { %2023 = vst [vmem:[#allocation27_spill] sm:$0xff] %v1395_v35  ;;  %v68_v11 = vsel %vm1438_vm3, %v67_v32, %v63_v37  ;;  %258 = vmatpush.msra.mxu2 %v1399_v36  ;;  %v206_v32 = vsub.f32 %v1419_v54, %v1466_v56  ;;  %v212_v37 = vsub.f32 %v1454_v13, %v1482_v57 }
  0x20   :  { %2024 = vst [vmem:[#allocation28_spill] sm:$0xff] %v1399_v36  ;;  %v1474_v55 = vmul.f32 %v68_v11, %v1182_v0  ;;  %184 = vmatpush.msra.mxu1 %v1461_v45  ;;  %v1489_v0 = vand.u32 4294901760, %v194_v63  ;;  %107 = vmatpush.msra.mxu0 %v1387_v30  ;;  %v1496_v42 = vand.u32 4294901760, %v200_v12  ;;  %v33_v12 = vld [vmem:[%s1940_s1 + $0x78] sm:$0xff] }
  0x21   :  { %2025 = vst [vmem:[#allocation29_spill] sm:$0xff] %v1406_v49  ;;  %261 = vmatpush.msra.mxu2 %v1416_v53  ;;  %v1504_v63 = vand.u32 4294901760, %v206_v32  ;;  %301 = vmatpush.msra.mxu3 %v1378_v9  ;;  %v1510_v11 = vand.u32 4294901760, %v212_v37  ;;  %v31_v32 = vld [vmem:[%s1940_s1 + $0x68] sm:$0xff]  ;;  %v1555_v37 = vand.u32 4294901760, %v33_v12 }
  0x22   :  { %2026 = vst [vmem:[#allocation30_spill] sm:$0xff] %v1412_v51  ;;  %v72_v62 = vsel %vm71_vm4, %v1474_v55, -inf  ;;  %190 = vmatpush.msra.mxu1 %v1477_v34  ;;  %109 = vmatpush.msra.mxu0 %v1406_v49 }
  0x23   :  { %2027 = vst [vmem:[#allocation31_spill] sm:$0xff] %v1416_v53  ;;  %73 = vmax.xlane.f32.xlu0 %v72_v62  ;;  %264 = vmatpush.msra.mxu2 %v1419_v54  ;;  %v32_v62 = vld [vmem:[%s1940_s1 + $0x70] sm:$0xff] }
  0x24   :  { %2028 = vst [vmem:[#allocation32_spill] sm:$0xff] %v1419_v54  ;;  %316 = vmatpush.msrb.mxu0 %v1238_v22  ;;  %196 = vmatpush.msra.mxu1 %v1489_v0  ;;  %v30_v54 = vld [vmem:[%s1940_s1 + $0x60] sm:$0xff]  ;;  %v28_v53 = vld [vmem:[%s1940_s1 + $0x50] sm:$0xff] }
  0x25   :  { %2029 = vst [vmem:[#allocation33_spill] sm:$0xff] %v1429_v29  ;;  %267 = vmatpush.msra.mxu2 %v1454_v13  ;;  %303 = vmatpush.msra.mxu3 %v1387_v30  ;;  %v1570_v36 = vand.u32 4294901760, %v30_v54  ;;  %v1574_v5 = vand.u32 4294901760, %v28_v53 }
  0x26   :  { %2034 = vst [vmem:[#allocation34_spill] sm:$0xff] %v1450_v28  ;;  %320 = vmatpush.msrb.mxu0 %v1241_v23  ;;  %202 = vmatpush.msra.mxu1 %v1496_v42 }
  0x27   :  { %2035 = vst [vmem:[#allocation35_spill] sm:$0xff] %v1454_v13  ;;  %305 = vmatpush.msra.mxu3 %v1406_v49  ;;  %v1557_v13 = vand.u32 4294901760, %v32_v62  ;;  %425 = vmatpush.msrb.mxu2 %v1555_v37 }
  0x28   :  { %2036 = vst [vmem:[#allocation36_spill] sm:$0xff] %v1466_v56  ;;  %324 = vmatpush.msrb.mxu0 %v1244_v24  ;;  %208 = vmatpush.msra.mxu1 %v1504_v63 }
  0x29   :  { %2037 = vst [vmem:[#allocation37_spill] sm:$0xff] %v1482_v57  ;;  %427 = vmatpush.msrb.mxu2 %v1557_v13 }
  0x2a   :  { %2038 = vst [vmem:[#allocation38_spill] sm:$0xff] %v1510_v11  ;;  %328 = vmatpush.msrb.mxu0 %v1251_v26  ;;  %214 = vmatpush.msra.mxu1 %v1510_v11 }
  0x2c   :  { %383 = vmatpush.msrb.mxu1 %v1194_v6  ;;  %332 = vmatpush.msrb.mxu0 %v1271_v33 }
  0x2e   :  { %385 = vmatpush.msrb.mxu1 %v1196_v7  ;;  %336 = vmatpush.msrb.mxu0 %v1291_v41  ;;  %v1597_v41 = vsub.f32 %v28_v53, %v1574_v5  ;;  %v26_v53 = vld [vmem:[%s1940_s1 + $0x40] sm:$0xff] }
  0x30   :  { %387 = vmatpush.msrb.mxu1 %v1198_v8  ;;  %340 = vmatpush.msrb.mxu0 %v1297_v43 }
  0x32   :  { %389 = vmatpush.msrb.mxu1 %v1203_v10  ;;  %344 = vmatpush.msrb.mxu0 %v1313_v48  ;;  %v1591_v48 = vsub.f32 %v30_v54, %v1570_v36 }
  0x34   :  { %391 = vmatpush.msrb.mxu1 %v1231_v19  ;;  %348 = vmatpush.msrb.mxu0 %v1361_v1 }
  0x36   :  { %393 = vmatpush.msrb.mxu1 %v1233_v20  ;;  %352 = vmatpush.msrb.mxu0 %v1364_v2  ;;  %v1584_v2 = vsub.f32 %v32_v62, %v1557_v13 }
  0x38   :  { %395 = vmatpush.msrb.mxu1 %v1235_v21  ;;  %356 = vmatpush.msrb.mxu0 %v1395_v35  ;;  %v1581_v35 = vsub.f32 %v33_v12, %v1555_v37  ;;  %v1967_v62 = vand.u32 4294901760, %v1584_v2 }
  0x3a   :  { %397 = vmatpush.msrb.mxu1 %v1247_v25  ;;  %360 = vmatpush.msrb.mxu0 %v1412_v51  ;;  %v27_v51 = vld [vmem:[%s1940_s1 + $0x48] sm:$0xff]  ;;  %v1966_v12 = vand.u32 4294901760, %v1581_v35 }
  0x3c   :  { %399 = vmatpush.msrb.mxu1 %v1307_v46  ;;  %364 = vmatpush.msrb.mxu0 %v1429_v29 }
  0x3e   :  { %401 = vmatpush.msrb.mxu1 %v1309_v47  ;;  %368 = vmatpush.msrb.mxu0 %v1450_v28 }
  0x40   :  { %403 = vmatpush.msrb.mxu1 %v1349_v59  ;;  %372 = vmatpush.msrb.mxu0 %v1466_v56  ;;  %v29_v56 = vld [vmem:[%s1940_s1 + $0x58] sm:$0xff] }
  0x41   :  { %v1572_v29 = vand.u32 4294901760, %v29_v56 }
  0x42   :  { %405 = vmatpush.msrb.mxu1 %v1351_v60  ;;  %376 = vmatpush.msrb.mxu0 %v1482_v57  ;;  %v1559_v57 = vand.u32 4294901760, %v31_v32 }
  0x43   :  { %v1594_v43 = vsub.f32 %v29_v56, %v1572_v29 }
  0x44   :  { %407 = vmatpush.msrb.mxu1 %v1353_v61  ;;  %v1587_v1 = vsub.f32 %v31_v32, %v1559_v57  ;;  %v474_v32 = vsub.f32 %v1584_v2, %v1967_v62  ;;  %429 = vmatpush.msrb.mxu2 %v1559_v57  ;;  %v23_v62 = vld [vmem:[%s1940_s1 + $0x28] sm:$0xff] }
  0x45   :  { %v2041_v15 = vand.u32 4294901760, %v1594_v43 }
  0x46   :  { %409 = vmatpush.msrb.mxu1 %v1378_v9  ;;  %v2039_v54 = vand.u32 4294901760, %v1587_v1  ;;  %v475_v33 = vand.u32 4294901760, %v474_v32  ;;  %431 = vmatpush.msrb.mxu2 %v1570_v36 }
  0x47   :  { %v492_v24 = vsub.f32 %v1594_v43, %v2041_v15 }
  0x48   :  { %411 = vmatpush.msrb.mxu1 %v1387_v30  ;;  %v480_v27 = vsub.f32 %v1587_v1, %v2039_v54  ;;  %v2040_v54 = vand.u32 4294901760, %v1591_v48  ;;  %433 = vmatpush.msrb.mxu2 %v1572_v29 }
  0x49   :  { %v493_v9 = vand.u32 4294901760, %v492_v24 }
  0x4a   :  { %413 = vmatpush.msrb.mxu1 %v1406_v49  ;;  %v486_v16 = vsub.f32 %v1591_v48, %v2040_v54  ;;  %v481_v26 = vand.u32 4294901760, %v480_v27  ;;  %v1651_v54 = vand.u32 4294901760, %v23_v62  ;;  %v2042_v27 = vand.u32 4294901760, %v1597_v41  ;;  %435 = vmatpush.msrb.mxu2 %v1574_v5 }
  0x4c   :  { %v498_v22 = vsub.f32 %v1597_v41, %v2042_v27  ;;  %v487_v15 = vand.u32 4294901760, %v486_v16 }
  0x96   :  { %v74_v28 = vpop.xlane.xlu0 %73 }
  0x97   :  { %v75_v4 = vsub.f32 %v1474_v55, %v74_v28  ;;  %v1599_v28 = vand.u32 4294901760, %v27_v51 }
  0x99   :  { %v76_v55 = vmul.f32 1.442695, %v75_v4  ;;  %v1608_v56 = vsub.f32 %v27_v51, %v1599_v28  ;;  %v468_v4 = vsub.f32 %v1581_v35, %v1966_v12  ;;  %v24_v12 = vld [vmem:[%s1940_s1 + $0x30] sm:$0xff]  ;;  %v1637_v51 = vand.u32 4294901760, %v26_v53  ;;  %437 = vmatpush.msrb.mxu2 %v1599_v28 }
  0x9b   :  { %1146 = vpow2.f32 %v76_v55  ;;  %v25_v55 = vld [vmem:[%s1940_s1 + $0x38] sm:$0xff]  ;;  %v469_v18 = vand.u32 4294901760, %v468_v4  ;;  %v1644_v23 = vsub.f32 %v26_v53, %v1637_v51  ;;  %v1649_v4 = vand.u32 4294901760, %v24_v12  ;;  %439 = vmatpush.msrb.mxu2 %v1637_v51 }
  0x9c   :  { %v1647_v32 = vand.u32 4294901760, %v25_v55  ;;  %v2044_v27 = vand.u32 4294901760, %v1608_v56 }
  0x9d   :  { %470 = vmatpush.msrb.mxu3 %v469_v18  ;;  %v1985_v18 = vand.u32 4294901760, %v1644_v23  ;;  %v1664_v14 = vsub.f32 %v24_v12, %v1649_v4  ;;  %v499_v12 = vand.u32 4294901760, %v498_v22 }
  0x9e   :  { %v1660_v53 = vsub.f32 %v25_v55, %v1647_v32  ;;  %v504_v11 = vsub.f32 %v1608_v56, %v2044_v27  ;;  %441 = vmatpush.msrb.mxu2 %v1647_v32 }
  0x9f   :  { %476 = vmatpush.msrb.mxu3 %v475_v33  ;;  %v1673_v33 = vsub.f32 %v23_v62, %v1651_v54  ;;  %v510_v24 = vsub.f32 %v1644_v23, %v1985_v18 }
  0xa0   :  { %v1988_v16 = vand.u32 4294901760, %v1660_v53  ;;  %v505_v62 = vand.u32 4294901760, %v504_v11  ;;  %443 = vmatpush.msrb.mxu2 %v1649_v4 }
  0xa1   :  { %v1656_v49 = vpop.eup %1146  ;;  %482 = vmatpush.msrb.mxu3 %v481_v26  ;;  %v1991_v26 = vand.u32 4294901760, %v1664_v14  ;;  %v1989_v22 = vand.u32 4294901760, %v1673_v33  ;;  %v511_v18 = vand.u32 4294901760, %v510_v24  ;;  %v20_v24 = vld [vmem:[%s1940_s1 + $0x10] sm:$0xff] }
  0xa2   :  { %2043 = vst [vmem:[#allocation39_spill] sm:$0xff] %v1656_v49  ;;  %v110_v30 = vand.u32 4294901760, %v1656_v49  ;;  %445 = vmatpush.msrb.mxu2 %v1651_v54 }
  0xa3   :  { %488 = vmatpush.msrb.mxu3 %v487_v15  ;;  %v522_v61 = vsub.f32 %v1664_v14, %v1991_v26 }
  0xa4   :  { %216 = vmatmul.f32.vlgmr.msra.gmra.mxu1 %v110_v30  ;;  %v111_v55 = vsub.f32 %v1656_v49, %v110_v30  ;;  %v516_v49 = vsub.f32 %v1660_v53, %v1988_v16  ;;  %v528_v16 = vsub.f32 %v1673_v33, %v1989_v22 }
  0xa5   :  { %621 = vmatpush.msra.mxu1 %v1555_v37  ;;  %494 = vmatpush.msrb.mxu3 %v493_v9 }
  0xa6   :  { %270 = vmatmul.f32.vlgmr.msra.gmra.mxu2 %v111_v55  ;;  %v112_v27 = vand.u32 4294901760, %v111_v55  ;;  %v517_v11 = vand.u32 4294901760, %v516_v49  ;;  %v21_v49 = vld [vmem:[%s1940_s1 + $0x18] sm:$0xff] }
  0xa7   :  { %623 = vmatpush.msra.mxu1 %v1557_v13  ;;  %500 = vmatpush.msrb.mxu3 %v499_v12  ;;  %v529_v12 = vand.u32 4294901760, %v528_v16  ;;  %v1727_v16 = vand.u32 4294901760, %v21_v49 }
  0xa8   :  { %309 = vmatmul.f32.vlgmr.msra.gmra.mxu3 %v112_v27  ;;  %v113_v15 = vsub.f32 %v111_v55, %v112_v27  ;;  %v523_v55 = vand.u32 4294901760, %v522_v61  ;;  %v22_v61 = vld [vmem:[%s1940_s1 + $0x20] sm:$0xff] }
  0xa9   :  { %625 = vmatpush.msra.mxu1 %v1559_v57  ;;  %506 = vmatpush.msrb.mxu3 %v505_v62  ;;  %2046 = vst [vmem:[#allocation41_spill] sm:$0xff] %v1727_v16  ;;  %v1736_v62 = vsub.f32 %v21_v49, %v1727_v16 }
  0xaa   :  { %v114_v9 = vand.u32 4294901760, %v113_v15  ;;  %v1738_v15 = vand.u32 4294901760, %v20_v24 }
  0xab   :  { %512 = vmatpush.msrb.mxu3 %v511_v18  ;;  %627 = vmatpush.msra.mxu1 %v1570_v36 }
  0xac   :  { %115 = vmatmul.f32.vlgmr.msra.gmra.mxu0 %v114_v9  ;;  %415 = vmatmul.f32.vlgmr.msrb.gmra.mxu1 %v110_v30  ;;  %2047 = vst [vmem:[#allocation42_spill] sm:$0xff] %v1738_v15  ;;  %v19_v9 = vld [vmem:[%s1940_s1 + $0x8] sm:$0xff] }
  0xad   :  { %568 = vmatpush.msra.mxu0 %v1581_v35  ;;  %518 = vmatpush.msrb.mxu3 %v517_v11 }
  0xae   :  { %629 = vmatpush.msra.mxu1 %v1572_v29 }
  0xaf   :  { %571 = vmatpush.msra.mxu0 %v1584_v2  ;;  %524 = vmatpush.msrb.mxu3 %v523_v55  ;;  %v1993_v55 = vand.u32 4294901760, %v1736_v62 }
  0xb0   :  { %631 = vmatpush.msra.mxu1 %v1574_v5 }
  0xb1   :  { %574 = vmatpush.msra.mxu0 %v1587_v1  ;;  %530 = vmatpush.msrb.mxu3 %v529_v12  ;;  %v1751_v12 = vsub.f32 %v20_v24, %v1738_v15  ;;  %v540_v22 = vsub.f32 %v1736_v62, %v1993_v55  ;;  %v18_v24 = vld [vmem:[%s1940_s1] sm:$0xff] }
  0xb2   :  { %633 = vmatpush.msra.mxu1 %v1599_v28 }
  0xb3   :  { %577 = vmatpush.msra.mxu0 %v1591_v48 }
  0xb4   :  { %378 = vmatmul.f32.vlgmr.msrb.gmra.mxu0 %v110_v30  ;;  %635 = vmatpush.msra.mxu1 %v1637_v51  ;;  %v1719_v30 = vand.u32 4294901760, %v22_v61 }
  0xb5   :  { %580 = vmatpush.msra.mxu0 %v1594_v43 }
  0xb6   :  { %637 = vmatpush.msra.mxu1 %v1647_v32  ;;  %2045 = vst [vmem:[#allocation40_spill] sm:$0xff] %v1719_v30  ;;  %v1725_v18 = vsub.f32 %v22_v61, %v1719_v30  ;;  %447 = vmatpush.msrb.mxu2 %v1719_v30  ;;  %v1753_v61 = vand.u32 4294901760, %v19_v9 }
  0xb7   :  { %583 = vmatpush.msra.mxu0 %v1597_v41 }
  0xb8   :  { %639 = vmatpush.msra.mxu1 %v1649_v4  ;;  %v1990_v27 = vand.u32 4294901760, %v1725_v18  ;;  %449 = vmatpush.msrb.mxu2 %v1727_v16  ;;  %2048 = vst [vmem:[#allocation43_spill] sm:$0xff] %v1753_v61  ;;  %v1763_v26 = vsub.f32 %v19_v9, %v1753_v61 }
  0xb9   :  { %586 = vmatpush.msra.mxu0 %v1608_v56 }
  0xba   :  { %641 = vmatpush.msra.mxu1 %v1651_v54  ;;  %v534_v11 = vsub.f32 %v1725_v18, %v1990_v27  ;;  %451 = vmatpush.msrb.mxu2 %v1738_v15  ;;  %v1996_v27 = vand.u32 4294901760, %v1751_v12  ;;  %v551_v9 = vand.u32 4294901760, %v1763_v26 }
  0xbb   :  { %589 = vmatpush.msra.mxu0 %v1644_v23 }
  0xbc   :  { %643 = vmatpush.msra.mxu1 %v1719_v30  ;;  %v535_v49 = vand.u32 4294901760, %v534_v11  ;;  %453 = vmatpush.msrb.mxu2 %v1753_v61  ;;  %v541_v11 = vand.u32 4294901760, %v540_v22  ;;  %v546_v55 = vsub.f32 %v1751_v12, %v1996_v27  ;;  %v552_v22 = vsub.f32 %v1763_v26, %v551_v9 }
  0xbd   :  { %592 = vmatpush.msra.mxu0 %v1660_v53 }
  0xbe   :  { %645 = vmatpush.msra.mxu1 %v1727_v16  ;;  %v1770_v16 = vand.u32 4294901760, %v18_v24  ;;  %536 = vmatpush.msrb.mxu3 %v535_v49  ;;  %v547_v30 = vand.u32 4294901760, %v546_v55  ;;  %v2049_v49 = vand.u32 4294901760, %v1581_v35  ;;  %v2051_v35 = vand.u32 4294901760, %v1587_v1  ;;  %v2063_v1 = vld [vmem:[#allocation20_spill] sm:$0xff] }
  0xbf   :  { %595 = vmatpush.msra.mxu0 %v1664_v14 }
  0xc0   :  { %647 = vmatpush.msra.mxu1 %v1738_v15  ;;  %v1779_v15 = vsub.f32 %v18_v24, %v1770_v16  ;;  %455 = vmatpush.msrb.mxu2 %v1770_v16  ;;  %v553_v24 = vand.u32 4294901760, %v552_v22  ;;  %v2084_v22 = vld [vmem:[#allocation11_spill] sm:$0xff] }
  0xc1   :  { %598 = vmatpush.msra.mxu0 %v1673_v33  ;;  %542 = vmatpush.msrb.mxu3 %v541_v11 }
  0xc2   :  { %649 = vmatpush.msra.mxu1 %v1753_v61  ;;  %662 = vmatpush.msra.mxu2 %v2049_v49  ;;  %v557_v27 = vand.u32 4294901760, %v1779_v15  ;;  %v2050_v61 = vand.u32 4294901760, %v1584_v2  ;;  %v2064_v2 = vld [vmem:[#allocation40_spill] sm:$0xff] }
  0xc3   :  { %601 = vmatpush.msra.mxu0 %v1725_v18  ;;  %548 = vmatpush.msrb.mxu3 %v547_v30  ;;  %v2073_v30 = vld [vmem:[#allocation6_spill] sm:$0xff]  ;;  %v2086_v49 = vld [vmem:[#allocation12_spill] sm:$0xff] }
  0xc4   :  { %651 = vmatpush.msra.mxu1 %v1770_v16  ;;  %666 = vmatpush.msra.mxu2 %v2050_v61  ;;  %v558_v55 = vsub.f32 %v1779_v15, %v557_v27  ;;  %v2079_v61 = vld [vmem:[#allocation4_spill] sm:$0xff] }
  0xc5   :  { %604 = vmatpush.msra.mxu0 %v1736_v62  ;;  %554 = vmatpush.msrb.mxu3 %v553_v24  ;;  %v2088_v24 = vld [vmem:[#allocation14_spill] sm:$0xff] }
  0xc6   :  { %812 = vmatpush.msrb.mxu1 %v1284_v38  ;;  %670 = vmatpush.msra.mxu2 %v2051_v35  ;;  %v559_v11 = vand.u32 4294901760, %v558_v55  ;;  %v2052_v38 = vand.u32 4294901760, %v1591_v48  ;;  %v2055_v48 = vand.u32 4294901760, %v1608_v56  ;;  %v2090_v55 = vld [vmem:[#allocation18_spill] sm:$0xff]  ;;  %v2092_v35 = vld [vmem:[#allocation19_spill] sm:$0xff] }
  0xc7   :  { %607 = vmatpush.msra.mxu0 %v1751_v12 }
  0xc8   :  { %818 = vmatpush.msrb.mxu1 %v1286_v39  ;;  %674 = vmatpush.msra.mxu2 %v2052_v38  ;;  %v2053_v39 = vand.u32 4294901760, %v1594_v43  ;;  %v2056_v43 = vand.u32 4294901760, %v1644_v23  ;;  %v2059_v23 = vand.u32 4294901760, %v1673_v33  ;;  %v2096_v38 = vld [vmem:[#allocation24_spill] sm:$0xff] }
  0xc9   :  { %610 = vmatpush.msra.mxu0 %v1763_v26  ;;  %560 = vmatpush.msrb.mxu3 %v559_v11  ;;  %v2094_v11 = vld [vmem:[#allocation23_spill] sm:$0xff] }
  0xca   :  { %824 = vmatpush.msrb.mxu1 %v1302_v44  ;;  %678 = vmatpush.msra.mxu2 %v2053_v39  ;;  %v2054_v44 = vand.u32 4294901760, %v1597_v41  ;;  %v2057_v41 = vand.u32 4294901760, %v1660_v53  ;;  %v2098_v39 = vld [vmem:[#allocation28_spill] sm:$0xff] }
  0xcb   :  { %613 = vmatpush.msra.mxu0 %v1779_v15  ;;  %729 = vmatpush.msra.mxu3 %v1555_v37  ;;  %v2076_v15 = vld [vmem:[#allocation8_spill] sm:$0xff] }
  0xcc   :  { %830 = vmatpush.msrb.mxu1 %v1327_v52  ;;  %682 = vmatpush.msra.mxu2 %v2054_v44  ;;  %v2058_v52 = vand.u32 4294901760, %v1664_v14  ;;  %v2061_v14 = vand.u32 4294901760, %v1736_v62  ;;  %v2075_v62 = vld [vmem:[#allocation2_spill] sm:$0xff]  ;;  %v2100_v44 = vld [vmem:[#allocation31_spill] sm:$0xff] }
  0xcd   :  { %767 = vmatpush.msrb.mxu0 %v1194_v6  ;;  %731 = vmatpush.msra.mxu3 %v1557_v13 }
  0xce   :  { %836 = vmatpush.msrb.mxu1 %v1346_v58  ;;  %686 = vmatpush.msra.mxu2 %v2055_v48  ;;  %v2062_v58 = vand.u32 4294901760, %v1751_v12  ;;  %v2077_v12 = vld [vmem:[#allocation3_spill] sm:$0xff]  ;;  %v2101_v48 = vld [vmem:[#allocation36_spill] sm:$0xff] }
  0xcf   :  { %769 = vmatpush.msrb.mxu0 %v1196_v7  ;;  %733 = vmatpush.msra.mxu3 %v1559_v57 }
  0xd0   :  { %842 = vmatpush.msrb.mxu1 %v1369_v3  ;;  %690 = vmatpush.msra.mxu2 %v2056_v43  ;;  %v2065_v3 = vld [vmem:[#allocation38_spill] sm:$0xff]  ;;  %v2102_v43 = vld [vmem:[#allocation32_spill] sm:$0xff] }
  0xd1   :  { %771 = vmatpush.msrb.mxu0 %v1198_v8  ;;  %735 = vmatpush.msra.mxu3 %v1570_v36  ;;  %v2068_v36 = vld [vmem:[#allocation26_spill] sm:$0xff] }
  0xd2   :  { %848 = vmatpush.msrb.mxu1 %v1385_v17  ;;  %694 = vmatpush.msra.mxu2 %v2057_v41  ;;  %v2067_v17 = vld [vmem:[#allocation41_spill] sm:$0xff] }
  0xd3   :  { %773 = vmatpush.msrb.mxu0 %v1203_v10  ;;  %737 = vmatpush.msra.mxu3 %v1572_v29  ;;  %v2060_v29 = vand.u32 4294901760, %v1725_v18  ;;  %v2103_v41 = vld [vmem:[#allocation37_spill] sm:$0xff] }
  0xd4   :  { %854 = vmatpush.msrb.mxu1 %v1402_v40  ;;  %698 = vmatpush.msra.mxu2 %v2058_v52  ;;  %v2069_v40 = vld [vmem:[#allocation42_spill] sm:$0xff]  ;;  %v2104_v52 = vld [vmem:[#allocation35_spill] sm:$0xff] }
  0xd5   :  { %775 = vmatpush.msrb.mxu0 %v1231_v19  ;;  %739 = vmatpush.msra.mxu3 %v1574_v5  ;;  %v2066_v5 = vld [vmem:[#allocation25_spill] sm:$0xff] }
  0xd6   :  { %860 = vmatpush.msrb.mxu1 %v1424_v31  ;;  %702 = vmatpush.msra.mxu2 %v2059_v23  ;;  %v2070_v31 = vld [vmem:[#allocation29_spill] sm:$0xff]  ;;  %v1141_v23 = vld [vmem:[%s1941_s2] ss:$0 sm:$0xff] }
  0xd7   :  { %777 = vmatpush.msrb.mxu0 %v1233_v20  ;;  %741 = vmatpush.msra.mxu3 %v1599_v28 }
  0xd8   :  { %866 = vmatpush.msrb.mxu1 %v1442_v50  ;;  %706 = vmatpush.msra.mxu2 %v2060_v29  ;;  %v2071_v50 = vld [vmem:[#allocation43_spill] sm:$0xff] }
  0xd9   :  { %779 = vmatpush.msrb.mxu0 %v1235_v21  ;;  %743 = vmatpush.msra.mxu3 %v1637_v51 }
  0xda   :  { %872 = vmatpush.msrb.mxu1 %v1461_v45  ;;  %710 = vmatpush.msra.mxu2 %v2061_v14 }
  0xdb   :  { %781 = vmatpush.msrb.mxu0 %v1247_v25  ;;  %745 = vmatpush.msra.mxu3 %v1647_v32 }
  0xdc   :  { %878 = vmatpush.msrb.mxu1 %v1477_v34  ;;  %714 = vmatpush.msra.mxu2 %v2062_v58 }
  0xdd   :  { %783 = vmatpush.msrb.mxu0 %v1307_v46  ;;  %747 = vmatpush.msra.mxu3 %v1649_v4  ;;  %v2072_v4 = vld [vmem:[#allocation39_spill] sm:$0xff] }
  0xde   :  { %884 = vmatpush.msrb.mxu1 %v1489_v0  ;;  %718 = vmatpush.msra.mxu2 %v551_v9  ;;  %v2081_v9 = vld [vmem:[#allocation5_spill] sm:$0xff] }
  0xdf   :  { %785 = vmatpush.msrb.mxu0 %v1309_v47  ;;  %749 = vmatpush.msra.mxu3 %v1651_v54 }
  0xe0   :  { %890 = vmatpush.msrb.mxu1 %v1496_v42  ;;  %722 = vmatpush.msra.mxu2 %v557_v27  ;;  %v2074_v27 = vld [vmem:[#allocation7_spill] sm:$0xff] }
  0xe1   :  { %787 = vmatpush.msrb.mxu0 %v1349_v59  ;;  %751 = vmatpush.msra.mxu3 %v2064_v2 }
  0xe2   :  { %896 = vmatpush.msrb.mxu1 %v1504_v63 }
  0xe3   :  { %789 = vmatpush.msrb.mxu0 %v1351_v60  ;;  %753 = vmatpush.msra.mxu3 %v2067_v17 }
  0xe4   :  { %902 = vmatpush.msrb.mxu1 %v2065_v3 }
  0xe5   :  { %791 = vmatpush.msrb.mxu0 %v2063_v1  ;;  %755 = vmatpush.msra.mxu3 %v2069_v40 }
  0xe7   :  { %793 = vmatpush.msrb.mxu0 %v2066_v5  ;;  %757 = vmatpush.msra.mxu3 %v2071_v50 }
  0xe9   :  { %795 = vmatpush.msrb.mxu0 %v2068_v36  ;;  %759 = vmatpush.msra.mxu3 %v1770_v16 }
  0xeb   :  { %797 = vmatpush.msrb.mxu0 %v2070_v31 }
 0x121   :  { %v217_v13 = vpop.f32.mrf.mxu1 }
 0x129   :  { %v116_v45 = vpop.f32.mrf.mxu0  ;;  %v271_v57 = vpop.f32.mrf.mxu2 }
 0x12a   :  { %v218_v34 = vadd.f32 %v217_v13, %v116_v45  ;;  %v416_v56 = vpop.f32.mrf.mxu1 }
 0x12b   :  { %v310_v42 = vpop.f32.mrf.mxu3 }
 0x12c   :  { %v272_v0 = vadd.f32 %v271_v57, %v218_v34 }
 0x12e   :  { %v311_v63 = vadd.f32 %v310_v42, %v272_v0 }
 0x131   :  { %v379_v37 = vpop.f32.mrf.mxu0 }
 0x132   :  { %v380_v28 = vadd.f32 %v379_v37, %v311_v63 }
 0x134   :  { %v417_v51 = vadd.f32 %v416_v56, %v380_v28 }
 0x136   :  { %1148 = vrcp.f32 %v417_v51 }
 0x13c   :  { %v1149_v32 = vpop.eup %1148 }
 0x13d   :  { %v420_v54 = vmul.f32 %v1149_v32, %v2072_v4 }
 0x13f   :  { %v456_v53 = vand.u32 4294901760, %v420_v54 }
 0x141   :  { %562 = vmatmul.f32.vlgmr.msrb.gmra.mxu3 %v456_v53  ;;  %v457_v33 = vsub.f32 %v420_v54, %v456_v53 }
 0x142   :  { %963 = vmatpush.msrb.mxu3 %v1194_v6 }
 0x143   :  { %616 = vmatmul.f32.vlgmr.msra.gmra.mxu0 %v457_v33  ;;  %v458_v26 = vand.u32 4294901760, %v457_v33 }
 0x144   :  { %965 = vmatpush.msrb.mxu3 %v1196_v7  ;;  %1004 = vmatpush.msra.mxu0 %v2073_v30 }
 0x145   :  { %655 = vmatmul.f32.vlgmr.msra.gmra.mxu1 %v458_v26  ;;  %v459_v18 = vsub.f32 %v457_v33, %v458_v26 }
 0x146   :  { %967 = vmatpush.msrb.mxu3 %v1198_v8  ;;  %1071 = vmatpush.msra.mxu1 %v1194_v6  ;;  %v2078_v6 = vld [vmem:[#allocation9_spill] sm:$0xff] }
 0x147   :  { %v460_v16 = vand.u32 4294901760, %v459_v18  ;;  %1008 = vmatpush.msra.mxu0 %v2074_v27 }
 0x148   :  { %969 = vmatpush.msrb.mxu3 %v1203_v10  ;;  %1073 = vmatpush.msra.mxu1 %v1196_v7  ;;  %v2080_v7 = vld [vmem:[#allocation13_spill] sm:$0xff] }
 0x149   :  { %461 = vmatmul.f32.vlgmr.msrb.gmra.mxu2 %v460_v16  ;;  %761 = vmatmul.f32.vlgmr.msra.gmra.mxu3 %v456_v53 }
 0x14a   :  { %910 = vmatpush.msrb.mxu2 %v2075_v62  ;;  %971 = vmatpush.msrb.mxu3 %v1231_v19 }
 0x14b   :  { %1075 = vmatpush.msra.mxu1 %v1198_v8  ;;  %1012 = vmatpush.msra.mxu0 %v2076_v15  ;;  %v2082_v8 = vld [vmem:[#allocation10_spill] sm:$0xff] }
 0x14c   :  { %913 = vmatpush.msrb.mxu2 %v2077_v12  ;;  %973 = vmatpush.msrb.mxu3 %v1233_v20 }
 0x14d   :  { %1077 = vmatpush.msra.mxu1 %v1203_v10  ;;  %1016 = vmatpush.msra.mxu0 %v2078_v6  ;;  %v2083_v10 = vld [vmem:[#allocation15_spill] sm:$0xff] }
 0x14e   :  { %916 = vmatpush.msrb.mxu2 %v2079_v61  ;;  %975 = vmatpush.msrb.mxu3 %v1235_v21 }
 0x14f   :  { %1079 = vmatpush.msra.mxu1 %v1231_v19  ;;  %1020 = vmatpush.msra.mxu0 %v2080_v7  ;;  %v2085_v19 = vld [vmem:[#allocation16_spill] sm:$0xff] }
 0x150   :  { %919 = vmatpush.msrb.mxu2 %v2081_v9  ;;  %977 = vmatpush.msrb.mxu3 %v1247_v25 }
 0x151   :  { %724 = vmatmul.f32.vlgmr.msra.gmra.mxu2 %v456_v53  ;;  %1081 = vmatpush.msra.mxu1 %v1233_v20  ;;  %v2087_v20 = vld [vmem:[#allocation17_spill] sm:$0xff] }
 0x152   :  { %922 = vmatpush.msrb.mxu2 %v2082_v8  ;;  %979 = vmatpush.msrb.mxu3 %v1307_v46 }
 0x153   :  { %1083 = vmatpush.msra.mxu1 %v1235_v21  ;;  %1024 = vmatpush.msra.mxu0 %v2083_v10  ;;  %v2089_v21 = vld [vmem:[#allocation21_spill] sm:$0xff] }
 0x154   :  { %925 = vmatpush.msrb.mxu2 %v2084_v22  ;;  %981 = vmatpush.msrb.mxu3 %v1309_v47 }
 0x155   :  { %1085 = vmatpush.msra.mxu1 %v1247_v25  ;;  %1028 = vmatpush.msra.mxu0 %v2085_v19  ;;  %v2091_v25 = vld [vmem:[#allocation22_spill] sm:$0xff] }
 0x156   :  { %928 = vmatpush.msrb.mxu2 %v2086_v49  ;;  %983 = vmatpush.msrb.mxu3 %v1349_v59 }
 0x157   :  { %1087 = vmatpush.msra.mxu1 %v1307_v46  ;;  %1032 = vmatpush.msra.mxu0 %v2087_v20  ;;  %v2093_v46 = vld [vmem:[#allocation27_spill] sm:$0xff] }
 0x158   :  { %931 = vmatpush.msrb.mxu2 %v2088_v24  ;;  %985 = vmatpush.msrb.mxu3 %v1351_v60 }
 0x159   :  { %1089 = vmatpush.msra.mxu1 %v1309_v47  ;;  %1036 = vmatpush.msra.mxu0 %v2089_v21  ;;  %v2095_v47 = vld [vmem:[#allocation30_spill] sm:$0xff] }
 0x15a   :  { %934 = vmatpush.msrb.mxu2 %v2090_v55  ;;  %987 = vmatpush.msrb.mxu3 %v2063_v1 }
 0x15b   :  { %1091 = vmatpush.msra.mxu1 %v1349_v59  ;;  %1040 = vmatpush.msra.mxu0 %v2091_v25  ;;  %v2097_v59 = vld [vmem:[#allocation33_spill] sm:$0xff] }
 0x15c   :  { %937 = vmatpush.msrb.mxu2 %v2092_v35  ;;  %989 = vmatpush.msrb.mxu3 %v2066_v5 }
 0x15d   :  { %1093 = vmatpush.msra.mxu1 %v1351_v60  ;;  %1044 = vmatpush.msra.mxu0 %v2093_v46  ;;  %v2099_v60 = vld [vmem:[#allocation34_spill] sm:$0xff] }
 0x15e   :  { %940 = vmatpush.msrb.mxu2 %v2094_v11  ;;  %991 = vmatpush.msrb.mxu3 %v2068_v36 }
 0x15f   :  { %1095 = vmatpush.msra.mxu1 %v2063_v1  ;;  %1048 = vmatpush.msra.mxu0 %v2095_v47 }
 0x160   :  { %943 = vmatpush.msrb.mxu2 %v2096_v38  ;;  %993 = vmatpush.msrb.mxu3 %v2070_v31 }
 0x161   :  { %1097 = vmatpush.msra.mxu1 %v2066_v5  ;;  %1052 = vmatpush.msra.mxu0 %v2097_v59 }
 0x162   :  { %946 = vmatpush.msrb.mxu2 %v2098_v39 }
 0x163   :  { %1099 = vmatpush.msra.mxu1 %v2068_v36  ;;  %1056 = vmatpush.msra.mxu0 %v2099_v60 }
 0x164   :  { %949 = vmatpush.msrb.mxu2 %v2100_v44 }
 0x165   :  { %1101 = vmatpush.msra.mxu1 %v2070_v31  ;;  %1060 = vmatpush.msra.mxu0 %v2101_v48 }
 0x166   :  { %952 = vmatpush.msrb.mxu2 %v2102_v43 }
 0x167   :  { %1064 = vmatpush.msra.mxu0 %v2103_v41 }
 0x168   :  { %955 = vmatpush.msrb.mxu2 %v2104_v52 }
 0x1c0   :  { %v617_v2 = vpop.f32.mrf.mxu0 }
 0x1c2   :  { %v656_v5 = vpop.f32.mrf.mxu1 }
 0x1c4   :  { %v563_v29 = vpop.f32.mrf.mxu3 }
 0x1cc   :  { %v462_v14 = vpop.f32.mrf.mxu2  ;;  %v762_v31 = vpop.f32.mrf.mxu3 }
 0x1cd   :  { %v463_v58 = vadd.f32 %v1141_v23, %v462_v14 }
 0x1cf   :  { %v564_v1 = vadd.f32 %v563_v29, %v463_v58 }
 0x1d1   :  { %v618_v3 = vadd.f32 %v617_v2, %v564_v1 }
 0x1d3   :  { %v657_v17 = vadd.f32 %v656_v5, %v618_v3 }
 0x1d4   :  { %v725_v36 = vpop.f32.mrf.mxu2 }
 0x1d5   :  { %v726_v40 = vadd.f32 %v725_v36, %v657_v17 }
 0x1d7   :  { %v763_v50 = vadd.f32 %v762_v31, %v726_v40 }
 0x1d9   :  { %v765_v13 = vmul.f32 %v763_v50, %v763_v50 }
 0x1db   :  { %v798_v45 = vand.u32 4294901760, %v765_v13 }
 0x1dd   :  { %v799_v34 = vsub.f32 %v765_v13, %v798_v45  ;;  %904 = vmatmul.f32.vlgmr.msrb.gmra.mxu1 %v798_v45 }
 0x1df   :  { %958 = vmatmul.f32.vlgmr.msrb.gmra.mxu2 %v799_v34  ;;  %v800_v57 = vand.u32 4294901760, %v799_v34 }
 0x1e1   :  { %997 = vmatmul.f32.vlgmr.msrb.gmra.mxu3 %v800_v57  ;;  %v801_v0 = vsub.f32 %v799_v34, %v800_v57 }
 0x1e3   :  { %v802_v42 = vand.u32 4294901760, %v801_v0 }
 0x1e5   :  { %803 = vmatmul.f32.vlgmr.msrb.gmra.mxu0 %v802_v42  ;;  %1103 = vmatmul.f32.vlgmr.msra.gmra.mxu1 %v798_v45 }
 0x1ed   :  { %1066 = vmatmul.f32.vlgmr.msra.gmra.mxu0 %v798_v45 }
 0x25a   :  { %v905_v63 = vpop.f32.mrf.mxu1 }
 0x262   :  { %v804_v37 = vpop.f32.mrf.mxu0  ;;  %v959_v56 = vpop.f32.mrf.mxu2 }
 0x263   :  { %v906_v28 = vadd.f32 %v905_v63, %v804_v37  ;;  %v1104_v33 = vpop.f32.mrf.mxu1 }
 0x264   :  { %v998_v32 = vpop.f32.mrf.mxu3 }
 0x265   :  { %v960_v51 = vadd.f32 %v959_v56, %v906_v28 }
 0x267   :  { %v999_v4 = vadd.f32 %v998_v32, %v960_v51 }
 0x26a   :  { %v1067_v54 = vpop.f32.mrf.mxu0 }
 0x26b   :  { %v1068_v53 = vadd.f32 %v1067_v54, %v999_v4 }
 0x26d   :  { %v1105_v26 = vadd.f32 %v1104_v33, %v1068_v53 }
 0x26f   :  { %v1107_v30 = vmul.f32 0.03125, %v1105_v26 }
 0x271   :  { %1150 = vrsqrt.f32 %v1107_v30  ;;  %vm1115_vm5 = vcmp.eq.f32.partialorder %v1107_v30, inf  ;;  %v1118_v61 = vand.u32 2147483648, %v1107_v30  ;;  %vm1117_vm6 = vcmp.eq.f32.partialorder %v1107_v30, 0.0 }
 0x277   :  { %v1151_v18 = vpop.eup %1150 }
 0x278   :  { %v1109_v16 = vmul.f32 %v1151_v18, %v1107_v30 }
 0x27a   :  { %v1110_v27 = vmul.f32 %v1151_v18, %v1109_v16 }
 0x27c   :  { %v1111_v62 = vmul.f32 0.5, %v1110_v27 }
 0x27e   :  { %v1112_v15 = vsub.f32 1.5, %v1111_v62 }
 0x280   :  { %v1113_v12 = vmul.f32 %v1151_v18, %v1112_v15 }
 0x282   :  { %v1114_v6 = vmul.f32 %v1113_v12, %v1107_v30 }
 0x284   :  { %v1116_v7 = vsel %vm1115_vm5, %v1107_v30, %v1114_v6 }
 0x285   :  { %v1119_v9 = vsel %vm1117_vm6, %v1118_v61, %v1116_v7 }
 0x286   :  { %v1120_v8 = vadd.f32 1e-08, %v1119_v9 }
 0x288   :  { %1152 = vrcp.f32 %v1120_v8  ;;  %v1132_v49 = vand.u32 2147483648, %v1120_v8  ;;  %v1130_v24 = vand.u32 2147483647, %v1120_v8  ;;  %vm1126_vm8 = vweird.f32 %v1120_v8 }
 0x28a   :  { %v1133_v55 = vor.u32 1.1754944e-38, %v1132_v49  ;;  %vm1131_vm10 = vcmp.eq.f32.partialorder %v1130_v24, 8.507059e+37 }
 0x28e   :  { %v1153_v10 = vpop.eup %1152 }
 0x28f   :  { %v1122_v22 = vmul.f32 %v1153_v10, %v1120_v8  ;;  %vm1127_vm7 = vweird.f32 %v1153_v10 }
 0x290   :  { %vm1128_vm9 = vmor %vm1126_vm8, %vm1127_vm7 }
 0x291   :  { %v1123_v19 = vsub.f32 1.0, %v1122_v22 }
 0x293   :  { %v1124_v20 = vmul.f32 %v1153_v10, %v1123_v19 }
 0x295   :  { %v1125_v21 = vadd.f32 %v1153_v10, %v1124_v20 }
 0x297   :  { %v1129_v25 = vsel %vm1128_vm9, %v1153_v10, %v1125_v21 }
 0x298   :  { %v1134_v35 = vsel %vm1131_vm10, %v1133_v55, %v1129_v25 }
 0x299   :  { %v1135_v46 = vmul.f32 %v1134_v35, %v763_v50 }
 0x29b   :  { %1136 = vst [vmem:[%s1942_s4] sm:$0xf] %v1135_v46 }

</bundles_post_ra>
